<compile_context>
chip_gen: v6e
topology: v6e:2x2x1
jax: 0.10.0
libtpu: 0.0.40
codegen_flags: <defaults>
</compile_context>

<pallas_src>
import math

import jax
import jax.numpy as jnp
from jax.experimental import pallas as pl
from jax.experimental.pallas import tpu as pltpu


def _build_pe(d_model: int, max_len: int = 5000, dtype=jnp.float32) -> jnp.ndarray:
    """Sinusoidal positional-encoding buffer, shape (1, max_len, d_model)."""
    assert d_model % 2 == 0, "sinusoidal positional encoding requires an even d_model"
    pos = jnp.arange(max_len, dtype=jnp.float32)[:, None]                        # (max_len, 1)
    div_term = jnp.exp(
        jnp.arange(0, d_model, 2, dtype=jnp.float32) * (-math.log(10000.0) / d_model)
    )                                                                             # (d_model/2,)
    pe = jnp.zeros((max_len, d_model), dtype=jnp.float32)
    pe = pe.at[:, 0::2].set(jnp.sin(pos * div_term))
    pe = pe.at[:, 1::2].set(jnp.cos(pos * div_term))
    return pe[None, :, :].astype(dtype)                                           # (1, max_len, d_model)


def _add_pe_kernel(x_ref, pe_ref, o_ref):
    # x_ref/o_ref: (B, TS, D) tile; pe_ref: (1, TS, D) tile.
    # jnp broadcasting handles the batch-broadcast inside the block (pure VPU add).
    o_ref[...] = x_ref[...] + pe_ref[...]


def _round_down(x: int, m: int) -> int:
    return (x // m) * m


def positional_encoding_forward(x: jnp.ndarray, pe: jnp.ndarray) -> jnp.ndarray:
    """x: (batch, seq_len, d_model); pe: (1, max_len, d_model). Returns x + pe[:, :seq_len]."""
    batch, seq_len, d_model = x.shape
    dtype = x.dtype
    itemsize = jnp.dtype(dtype).itemsize

    # Keep pe in the compute dtype (in a real model the buffer is stored in this
    # dtype once; here the cast is a one-time wrapper cost). Avoids an f32
    # promotion feeding a narrower out ref and halves pe HBM bytes for bf16.
    if pe.dtype != dtype:
        pe = pe.astype(dtype)

    # Sublane alignment: (8,128) f32, (16,128) bf16, (32,128) int8/fp8.
    align = max(8, 32 // itemsize)

    # --- VMEM budget (generation-aware) ---------------------------------------
    try:
        phys_vmem = int(getattr(pltpu.get_tpu_info(), "vmem_capacity_bytes", 64 << 20))
    except Exception:  # pragma: no cover - conservative fallback (v7x per-TC size)
        phys_vmem = 64 << 20
    total_budget = min(24 << 20, phys_vmem // 2)   # all pipeline buffers together
    vmem_limit = min(32 << 20, phys_vmem // 2)     # explicit scoped-VMEM limit

    bytes_per_row = d_model * itemsize
    cost = pl.CostEstimate(
        flops=batch * seq_len * d_model,
        transcendentals=0,
        bytes_accessed=(2 * batch * seq_len + seq_len) * d_model * itemsize,
    )

    if seq_len < align:
        # Tiny ragged sequence (smaller than one sublane tile): a single
        # full-extent block is the only layout-legal option; pe must then be
        # sliced so its block equals its full extent (copy is < align rows).
        ts = seq_len
        pe_op = pe[:, :seq_len, :]
        grid = (1,)
        x_spec = pl.BlockSpec((batch, ts, d_model), lambda s: (0, 0, 0))
        pe_spec = pl.BlockSpec((1, ts, d_model), lambda s: (0, 0, 0))
        out_spec = pl.BlockSpec((batch, ts, d_model), lambda s: (0, 0, 0))
        dims = ("parallel",)
    else:
        pe_op = pe  # full buffer; BlockSpec index_map selects rows (no HBM copy)
        seq_cap = max(align, _round_down(seq_len, align))  # keep block <= array dim

        # Rows affordable with the batch axis folded into the block:
        # x(2 bufs) + out(2 bufs) of (batch, ts, D) + pe(2 bufs) of (1, ts, D).
        rows_folded = _round_down(
            total_budget // (2 * (2 * batch + 1) * bytes_per_row), align
        )
        if rows_folded >= align:
            # Folded-batch path: grid (n_seq,), pe DMA'd once per seq tile,
            # single seq axis shards cleanly across v7x's 2 TensorCores.
            ts = min(rows_folded, seq_cap)
            grid = (pl.cdiv(seq_len, ts),)
            x_spec = pl.BlockSpec((batch, ts, d_model), lambda s: (0, s, 0))
            pe_spec = pl.BlockSpec((1, ts, d_model), lambda s: (0, s, 0))
            out_spec = pl.BlockSpec((batch, ts, d_model), lambda s: (0, s, 0))
            dims = ("parallel",)
        else:
            # Large-batch fallback: per-batch blocks, batch innermost so the pe
            # block index stays constant across consecutive steps.
            rows = max(align, _round_down(total_budget // (2 * 3 * bytes_per_row), align))
            ts = min(rows, seq_cap)
            grid = (pl.cdiv(seq_len, ts), batch)
            x_spec = pl.BlockSpec((1, ts, d_model), lambda s, b: (b, s, 0))
            pe_spec = pl.BlockSpec((1, ts, d_model), lambda s, b: (0, s, 0))
            out_spec = pl.BlockSpec((1, ts, d_model), lambda s, b: (b, s, 0))
            dims = ("parallel", "parallel")

    return pl.pallas_call(
        _add_pe_kernel,
        out_shape=jax.ShapeDtypeStruct((batch, seq_len, d_model), dtype),
        grid_spec=pl.GridSpec(
            grid=grid,
            in_specs=[x_spec, pe_spec],
            out_specs=out_spec,
        ),
        compiler_params=pltpu.CompilerParams(
            dimension_semantics=dims,
            vmem_limit_bytes=vmem_limit,
        ),
        cost_estimate=cost,
    )(x, pe_op)


if __name__ == "__main__":
    d_model = 512
    batch_size = 2
    seq_len = 10
    max_len = 5000

    # Deterministic "buffer" (register_buffer equivalent).
    pe = _build_pe(d_model, max_len)

    key = jax.random.PRNGKey(0)
    k1, k2 = jax.random.split(key)

    # Spec shapes (batch=2, seq_len=10, d_model=512). The module operates on the
    # embedded float input, so x here is (B, S, D) float (the torch demo's int
    # token ids feed an Embedding layer outside this module).
    x = jax.random.normal(k1, (batch_size, seq_len, d_model), dtype=jnp.float32)
    out = jax.block_until_ready(positional_encoding_forward(x, pe))
    ref = x + pe[:, :seq_len, :]
    assert out.shape == (batch_size, seq_len, d_model)
    assert out.dtype == x.dtype
    assert jnp.allclose(out, ref, atol=1e-6), "mismatch vs reference (f32, seq_len=10)"

    # bf16 path: exercises the dtype-aware pe cast + alignment handling.
    xb = jax.random.normal(k2, (batch_size, seq_len, d_model), dtype=jnp.bfloat16)
    outb = jax.block_until_ready(positional_encoding_forward(xb, pe))
    refb = xb + pe[:, :seq_len, :].astype(jnp.bfloat16)
    assert outb.dtype == jnp.bfloat16
    assert jnp.allclose(outb.astype(jnp.float32), refb.astype(jnp.float32), atol=1e-2), \
        "mismatch vs reference (bf16, seq_len=10)"

    print("KERNEL_OK")
</pallas_src>

<mosaic_0001>
module attributes {stable_mosaic.version = 11 : i64} {
  func.func @_add_pe_kernel(%arg0: i32, %arg1: memref<2x8x512xf32, #tpu.memory_space<vmem>>, %arg2: memref<1x8x512xf32, #tpu.memory_space<vmem>>, %arg3: memref<2x8x512xf32, #tpu.memory_space<vmem>>) attributes {dimension_semantics = [#tpu.dimension_semantics<parallel>], iteration_bounds = array<i64: 2>, scalar_prefetch = 0 : i64, scratch_operands = 0 : i64, tpu.core_type = #tpu.core_type<tc>, window_params = [{transform_indices = @transform_0, window_bounds = array<i64: 2, 8, 512>}, {transform_indices = @transform_1, window_bounds = array<i64: 1, 8, 512>}, {transform_indices = @transform_2, window_bounds = array<i64: 2, 8, 512>}]} {
    %c0 = arith.constant 0 : index
    %c0_0 = arith.constant 0 : index
    %c0_1 = arith.constant 0 : index
    %0 = vector.load %arg1[%c0, %c0_0, %c0_1] : memref<2x8x512xf32, #tpu.memory_space<vmem>>, vector<2x8x512xf32>
    %c0_2 = arith.constant 0 : index
    %c0_3 = arith.constant 0 : index
    %c0_4 = arith.constant 0 : index
    %1 = vector.load %arg2[%c0_2, %c0_3, %c0_4] : memref<1x8x512xf32, #tpu.memory_space<vmem>>, vector<1x8x512xf32>
    %2 = vector.broadcast %1 : vector<1x8x512xf32> to vector<2x8x512xf32>
    %3 = arith.addf %0, %2 : vector<2x8x512xf32>
    %c0_5 = arith.constant 0 : index
    %c0_6 = arith.constant 0 : index
    %c0_7 = arith.constant 0 : index
    %4 = vector.load %arg3[%c0_5, %c0_6, %c0_7] : memref<2x8x512xf32, #tpu.memory_space<vmem>>, vector<2x8x512xf32>
    tpu.vector_store %arg3[%c0_5, %c0_6, %c0_7], %3 {strides = array<i32>} : memref<2x8x512xf32, #tpu.memory_space<vmem>>, vector<2x8x512xf32>,
    return
  }
  func.func @transform_0(%arg0: i32) -> (i32, i32, i32) {
    %c0_i32 = arith.constant 0 : i32
    %c0_i32_0 = arith.constant 0 : i32
    %c0_i32_1 = arith.constant 0 : i32
    return %c0_i32, %arg0, %c0_i32_0 : i32, i32, i32
  }
  func.func @transform_1(%arg0: i32) -> (i32, i32, i32) {
    %c0_i32 = arith.constant 0 : i32
    %c0_i32_0 = arith.constant 0 : i32
    %c0_i32_1 = arith.constant 0 : i32
    return %c0_i32, %arg0, %c0_i32_0 : i32, i32, i32
  }
  func.func @transform_2(%arg0: i32) -> (i32, i32, i32) {
    %c0_i32 = arith.constant 0 : i32
    %c0_i32_0 = arith.constant 0 : i32
    %c0_i32_1 = arith.constant 0 : i32
    return %c0_i32, %arg0, %c0_i32_0 : i32, i32, i32
  }
}

</mosaic_0001>

<bundles_post_ra>
// kernel: tpu_custom_call.1
= control target key start
LH: loop header
LB: loop body
LE: loop exit
PB: predicated region body
PF: predicated region fallthrough
CT: control target
= control target key end

     0   :  { %7 = vsyncpa [#allocation4], 0  ;;  %s615_s0 = inlined_call_operand.vmem [shape: f32[2,10,512], index: 0, kind: input, shape index: {}]   ;;  %s616_s1 = inlined_call_operand.hbm [shape: f32[1,5000,512], index: 1, kind: input, shape index: {}]   ;;  %s617_s2 = inlined_call_operand.vmem [shape: f32[2,10,512], index: 2, kind: output, shape index: {}]  }
   0x1   :  { %9 = vsyncpa [#allocation4 + $0x1], 0  ;;  %s492_s9 = smov 0   ;;  %s494_s10 = smov 0  }
   0x2   :  { %s496_s11 = smov 0   ;;  %s498_s12 = smov 0  }
   0x3 LB: > { %s511_s13 = sadd.s32 4294967295, %s474_s12   ;;  %s514_s14 = sadd.s32 1, %s474_s12   ;;  %s474_s12 = sphi %s498_s12, %s625_s12   ;;  %s470_s11 = sphi %s496_s11, %s624_s11   ;;  %s466_s10 = sphi %s494_s10, %s623_s10   ;;  %s462_s9 = sphi %s492_s9, %s622_s9  }
   0x4   : > { %s19_s15 = ssub.s32 %s474_s12, %s514_s14  ;;  %s22_s16 = sadd.s32 1, %s470_s11 }
   0x5   : > { %p20_p0 = scmp.eq.s32.totalorder %s19_s15, 0  ;;  %p29_p1 = scmp.ne.s32.totalorder %s470_s11, %s466_s10 }
   0x6   : > { %p30_p2 = scmp.eq.s32.totalorder %s474_s12, 0  ;;  %p61_p3 = scmp.ne.s32.totalorder %s466_s10, %s462_s9 }
   0x7   : > { %s524_s17 = scalar_select %p20_p0, %s470_s11, %s22_s16  }
   0x8   : > { %p526_p4 = por %p30_p2, %p29_p1  ;;  %p62_p5 = scmp.eq.s32.totalorder %s511_s13, 0 }
   0x9   : > { %p85_p6 = scmp.eq.s32.totalorder %s511_s13, 1  ;;  %p361_p9 = scmp.ge.s32.totalorder %s474_s12, 2 }
   0xa   : > { %p532_p7 = por %p62_p5, %p61_p3 }
   0xb   : > { %p536_p8 = por %p85_p6, %p29_p1  ;;  %107 = sbr.rel (%p361_p9) target bundleno = 48 (0x30), region = 16 }
   0xd   : > { %s620_s20 = scalar_select %p536_p8, 1, 0 }
  0x10   : > { %110 = sbr.rel (!%p526_p4) target bundleno = 24 (0x18), region = 20  ;;  %s112_s21 = sand.u32 (%p526_p4), 1, %s470_s11  }
  0x11   : > { %s377_s22 = sshll.u32 (%p526_p4), %s474_s12, 5  ;;  %s362_s23 = sshll.u32 (%p526_p4), %s112_s21, 6 }
  0x12   : > { %s117_s26 = scalar_lea.vmem (%p526_p4), %s615_s0, %s377_s22  ;;  %s114_s27 = scalar_lea.vmem (%p526_p4), [#allocation2], %s362_s23 }
  0x13   : > { %v130_v0 = vld [vmem:[%s117_s26] sm:$0xff] (%p526_p4)  ;;  %v132_v1 = vld [vmem:[%s117_s26 + $0x8] sm:$0xff] (%p526_p4)  ;;  %v134_v2 = vld [vmem:[%s117_s26 + $0x10] sm:$0xff] (%p526_p4) }
  0x14   : > { %131 = vst [vmem:[%s114_s27] sm:$0xff] (%p526_p4), %v130_v0  ;;  %133 = vst [vmem:[%s114_s27 + $0x8] sm:$0xff] (%p526_p4), %v132_v1  ;;  %v136_v3 = vld [vmem:[%s117_s26 + $0x18] sm:$0xff] (%p526_p4)  ;;  %v138_v4 = vld [vmem:[%s117_s26 + $0x40] sm:$0xff] (%p526_p4) }
  0x15   : > { %135 = vst [vmem:[%s114_s27 + $0x10] sm:$0xff] %v134_v2  ;;  %v140_v5 = vld [vmem:[%s117_s26 + $0x48] sm:$0xff]  ;;  %137 = vst [vmem:[%s114_s27 + $0x18] sm:$0xff] %v136_v3  ;;  %v142_v6 = vld [vmem:[%s117_s26 + $0x50] sm:$0xff] }
  0x16   : > { %139 = vst [vmem:[%s114_s27 + $0x20] sm:$0xff] %v138_v4  ;;  %141 = vst [vmem:[%s114_s27 + $0x28] sm:$0xff] %v140_v5  ;;  %v144_v7 = vld [vmem:[%s117_s26 + $0x58] sm:$0xff] }
  0x17   : > { %143 = vst [vmem:[%s114_s27 + $0x30] sm:$0xff] %v142_v6  ;;  %145 = vst [vmem:[%s114_s27 + $0x38] sm:$0xff] %v144_v7 }
  0x18 PF: > { %s152_s28 = sand.u32 1, %s470_s11   ;;  %s378_s29 = sshll.u32 %s474_s12, 9 }
  0x19   : > { %s365_s30 = sshll.u32 %s152_s28, 5  ;;  %s553_s5 = scalar_lea.hbm %s616_s1, %s378_s29 }
  0x1a   : > { %s156_s6 = scalar_lea.vmem [#allocation3], %s365_s30  ;;  %s153_s8 = scalar_lea.sflag [#allocation4], %s152_s28 }
  0x1b   : > { %s164_s7 = sshll.u32 %s156_s6, 4  ;;  %s414_s9 = scalar_lea.hbm %s553_s5, 512  ;;  %s165_s7 = int_to_ptr.vmem [resolvable:$true] %s164_s7 }
  0x1c   : > { %p415_p10 = scmp.ne.s32.totalorder %s553_s5, %s414_s9  ;;  %s418_s21 = scalar_lea.hbm %s616_s1, 320000 }
  0x1d   : > { %p419_p13 = scmp.lt.s32.totalorder %s553_s5, %s616_s1  ;;  %p420_p0 = scmp.lt.s32.totalorder %s418_s21, %s414_s9 }
  0x1e   : > { %p416_p11 = pnand %p415_p10, %p526_p4 }
  0x1f   : > { %p421_p1 = por %p420_p0, %p419_p13 }
  0x20   : > { %p417_p12 = pneg %p416_p11 }
  0x22   : > { %p422_p2 = pnand %p421_p1, %p417_p12 }
  0x24   : > { %425 = shalt.err (!%p422_p2)
}
  0x25   : > { %s426_s24 = scalar_lea.vmem %s165_s7, 512  ;;  %s476_s25 = smov [#allocation3]  }
  0x26   : > { %p427_p3 = scmp.ne.s32.totalorder %s165_s7, %s426_s24  ;;  %s430_s26 = sshll.u32 %s476_s25, 4  ;;  %s431_s26 = int_to_ptr.vmem [resolvable:$false] %s430_s26 }
  0x27   : > { %s432_s27 = scalar_lea.vmem %s431_s26, 1024  ;;  %p433_p9 = scmp.lt.s32.totalorder %s165_s7, %s431_s26 }
  0x28   : > { %p428_p5 = pnand %p427_p3, %p526_p4  ;;  %p434_p10 = scmp.lt.s32.totalorder %s432_s27, %s426_s24 }
  0x2a   : > { %p429_p6 = pneg %p428_p5  ;;  %p435_p11 = por %p434_p10, %p433_p9 }
  0x2c   : > { %p436_p8 = pnand %p435_p11, %p429_p6 }
  0x2e   : > { %439 = shalt.err (!%p436_p8)
}
  0x2f   : > { %380 = dma.hbm_to_vmem [thread:$0]  (%p526_p4), %s553_s5, 512, %s165_s7, %s153_s8  }
  0x30 PF: > { %p368_p12 = scmp.ge.s32.totalorder %s474_s12, 1  ;;  %p169_p13 = scmp.lt.s32.totalorder %s474_s12, 3 }
  0x32   : > { %p170_p0 = pnand %p368_p12, %p169_p13 }
  0x33   : > { %s176_s28 = sand.u32 (!%p170_p0), 1, %s466_s10  }
  0x34   : > { %173 = sbr.rel (%p170_p0) target bundleno = 74 (0x4a), region = 47  ;;  %s369_s29 = sshll.u32 (!%p170_p0), %s176_s28, 6 }
  0x35   : > { %s370_s30 = sshll.u32 (!%p170_p0), %s176_s28, 5  ;;  %s178_s3 = scalar_lea.vmem (!%p170_p0), [#allocation2], %s369_s29 }
  0x36   : > { %s183_s4 = scalar_lea.sflag (!%p170_p0), [#allocation4], %s176_s28  ;;  %s186_s6 = scalar_lea.vmem (!%p170_p0), [#allocation3], %s370_s30 }
  0x39   : > { %457 = dma.done.wait (%p532_p7), %s183_s4, 512  }
  0x3a   : > { %459 = vsyncadd (%p532_p7), %s183_s4, 4294966784  ;;  %v210_v8 = vld [vmem:[%s178_s3] sm:$0xff]  ;;  %v211_v10 = vld [vmem:[%s178_s3 + $0x8] sm:$0xff]  ;;  %s578_s12 = scalar_lea.vmem [#allocation5], %s369_s29  ;;  %p621_p4 = scmp.ne.s32.totalorder %s620_s20, 0 }
  0x3b   : > { %v218_v9 = vld [vmem:[%s186_s6] sm:$0xff]  ;;  %v219_v12 = vld [vmem:[%s186_s6 + $0x8] sm:$0xff]  ;;  %v212_v13 = vld [vmem:[%s178_s3 + $0x10] sm:$0xff]  ;;  %s379_s18 = sshll.u32 (%p621_p4), %s511_s13, 5 }
  0x3c   : > { %v222_v11 = vadd.f32 %v218_v9, %v210_v8  ;;  %v220_v14 = vld [vmem:[%s186_s6 + $0x10] sm:$0xff]  ;;  %v223_v15 = vadd.f32 %v219_v12, %v211_v10  ;;  %v213_v17 = vld [vmem:[%s178_s3 + $0x18] sm:$0xff]  ;;  %v214_v19 = vld [vmem:[%s178_s3 + $0x20] sm:$0xff]  ;;  %s247_s7 = scalar_lea.vmem (%p621_p4), %s617_s2, %s379_s18 }
  0x3d   : > { %v224_v16 = vadd.f32 %v220_v14, %v212_v13  ;;  %v221_v18 = vld [vmem:[%s186_s6 + $0x18] sm:$0xff]  ;;  %v226_v21 = vadd.f32 %v218_v9, %v214_v19  ;;  %v215_v22 = vld [vmem:[%s178_s3 + $0x28] sm:$0xff]  ;;  %v216_v23 = vld [vmem:[%s178_s3 + $0x30] sm:$0xff]  ;;  %244 = sbr.rel (!%p621_p4) target bundleno = 74 (0x4a), region = 59 }
  0x3e   : > { %230 = vst [vmem:[%s578_s12] sm:$0xff] %v222_v11  ;;  %v225_v20 = vadd.f32 %v221_v18, %v213_v17  ;;  %v217_v24 = vld [vmem:[%s178_s3 + $0x38] sm:$0xff]  ;;  %231 = vst [vmem:[%s578_s12 + $0x8] sm:$0xff] %v223_v15  ;;  %v227_v25 = vadd.f32 %v219_v12, %v215_v22  ;;  %v228_v26 = vadd.f32 %v220_v14, %v216_v23 }
  0x3f   : > { %232 = vst [vmem:[%s578_s12 + $0x10] sm:$0xff] %v224_v16  ;;  %v229_v27 = vadd.f32 %v221_v18, %v217_v24  ;;  %234 = vst [vmem:[%s578_s12 + $0x20] sm:$0xff] %v226_v21 }
  0x40   : > { %233 = vst [vmem:[%s578_s12 + $0x18] sm:$0xff] %v225_v20  ;;  %235 = vst [vmem:[%s578_s12 + $0x28] sm:$0xff] %v227_v25 }
  0x41   : > { %236 = vst [vmem:[%s578_s12 + $0x30] sm:$0xff] %v228_v26  ;;  %237 = vst [vmem:[%s578_s12 + $0x38] sm:$0xff] %v229_v27 }
  0x45   : > { %v260_v28 = vld [vmem:[%s578_s12] sm:$0xff]  ;;  %v262_v29 = vld [vmem:[%s578_s12 + $0x8] sm:$0xff] }
  0x46   : > { %v264_v30 = vld [vmem:[%s578_s12 + $0x10] sm:$0xff]  ;;  %v268_v32 = vld [vmem:[%s578_s12 + $0x20] sm:$0xff]  ;;  %261 = vst [vmem:[%s247_s7] sm:$0xff] %v260_v28  ;;  %263 = vst [vmem:[%s247_s7 + $0x8] sm:$0xff] %v262_v29 }
  0x47   : > { %v266_v31 = vld [vmem:[%s578_s12 + $0x18] sm:$0xff]  ;;  %v270_v33 = vld [vmem:[%s578_s12 + $0x28] sm:$0xff]  ;;  %265 = vst [vmem:[%s247_s7 + $0x10] sm:$0xff] %v264_v30  ;;  %269 = vst [vmem:[%s247_s7 + $0x40] sm:$0xff] %v268_v32 }
  0x48   : > { %267 = vst [vmem:[%s247_s7 + $0x18] sm:$0xff] %v266_v31  ;;  %271 = vst [vmem:[%s247_s7 + $0x48] sm:$0xff] %v270_v33  ;;  %v272_v34 = vld [vmem:[%s578_s12 + $0x30] sm:$0xff]  ;;  %v274_v35 = vld [vmem:[%s578_s12 + $0x38] sm:$0xff] }
  0x49   : > { %273 = vst [vmem:[%s247_s7 + $0x50] sm:$0xff] %v272_v34  ;;  %275 = vst [vmem:[%s247_s7 + $0x58] sm:$0xff] %v274_v35 }
  0x4a PF: > { %p12_p7 = scmp.ge.s32.totalorder %s514_s14, 4   ;;  %s622_s9 = smov %s466_s10 }
  0x4b   : > { %s623_s10 = smov %s470_s11  ;;  %s624_s11 = smov %s524_s17 }
  0x4c   : > { %s625_s12 = smov %s514_s14  ;;  %14 = sbr.rel (!%p12_p7) target bundleno = 3 (0x3), region = 122 }
  0x51   :  { %291 = vsyncpa [#allocation4], 1 }
  0x52   :  { %293 = vsyncpa [#allocation4 + $0x1], 1 }

</bundles_post_ra>
